<compile_context>
chip_gen: v7x
topology: tpu7x:2x2x1
jax: 0.10.0
libtpu: 0.0.40
codegen_flags: <defaults>
</compile_context>

<pallas_src>
import jax
import jax.numpy as jnp
from jax.experimental import pallas as pl
from jax.experimental.pallas import tpu as pltpu


def _round_up(x, m):
    return ((x + m - 1) // m) * m


# ----------------------------------------------------------------------------
# Pallas kernel: fused un-pool (gather by `inverse`) + seg_head linear.
# grid = (N tiles [parallel], M tiles [arbitrary / reduction])
# ----------------------------------------------------------------------------
def _unpool_seghead_kernel(inv_ref, parent_ref, childp_ref, wp_ref, out_ref, acc_ref):
    mi = pl.program_id(1)
    tile_n = inv_ref.shape[0]
    tile_m = childp_ref.shape[0]

    # parent contribution: only once per N-tile (init of the accumulator)
    @pl.when(mi == 0)
    def _():
        acc_ref[...] = jnp.dot(parent_ref[...], wp_ref[...],
                               preferred_element_type=jnp.float32)

    # one-hot gather for this M-tile: row r has a 1 at global column inverse[r]
    idx = inv_ref[...]                                             # (TN, 1) int32
    cols = jax.lax.broadcasted_iota(jnp.int32, (tile_n, tile_m), 1) + mi * tile_m
    onehot = (cols == idx).astype(jnp.bfloat16)                    # cast only at MXU push

    # gathered, pre-projected child contribution (bias already folded in)
    acc_ref[...] += jnp.dot(onehot, childp_ref[...],
                            preferred_element_type=jnp.float32)

    @pl.when(mi == pl.num_programs(1) - 1)
    def _():
        out_ref[...] = acc_ref[...].astype(out_ref.dtype)


def unpool_and_seg_head(inverse, parent_feat, child_feat, weight, bias,
                        *, tile_n=256, tile_m=512):
    """seg_logits = Linear(cat([parent_feat, child_feat[inverse]], -1)).

    inverse:     (N,)  int indices into child_feat
    parent_feat: (N, Cp) float32
    child_feat:  (M, Cc) float32
    weight:      (num_classes, Cp + Cc) float32   (torch nn.Linear layout)
    bias:        (num_classes,) float32
    returns:     (N, num_classes) float32
    """
    n, cp = parent_feat.shape
    m, cc = child_feat.shape
    num_classes = weight.shape[0]
    assert weight.shape[1] == cp + cc

    # lane-dense class dim; tile-aligned (and clamped-for-small-input) row tiles
    nc_pad = _round_up(num_classes, 128)
    tile_n = min(tile_n, _round_up(n, 8))
    tile_m = min(tile_m, _round_up(m, 8))
    n_pad = _round_up(n, tile_n)
    m_pad = _round_up(m, tile_m)

    # split head weight; pre-project child feats and fold the bias in:
    #   onehot @ (child @ Wc.T + b) == child[inverse] @ Wc.T + b
    # because every one-hot row sums to exactly 1.
    wp = weight[:, :cp].T                                  # (Cp, nc)
    wc = weight[:, cp:].T                                  # (Cc, nc)
    child_proj = child_feat @ wc + bias[None, :]           # (M, nc)

    # zero-pad to tile/lane multiples
    wp_p = jnp.zeros((cp, nc_pad), jnp.float32).at[:, :num_classes].set(wp)
    cpj_p = jnp.zeros((m_pad, nc_pad), jnp.float32).at[:m, :num_classes].set(child_proj)
    par_p = jnp.zeros((n_pad, cp), jnp.float32).at[:n, :].set(parent_feat)
    inv_p = jnp.zeros((n_pad, 1), jnp.int32).at[:n, 0].set(inverse.astype(jnp.int32))

    # bf16 MXU inputs, f32 accumulation inside the kernel
    wp_p = wp_p.astype(jnp.bfloat16)
    cpj_p = cpj_p.astype(jnp.bfloat16)
    par_p = par_p.astype(jnp.bfloat16)

    grid = (n_pad // tile_n, m_pad // tile_m)
    out = pl.pallas_call(
        _unpool_seghead_kernel,
        out_shape=jax.ShapeDtypeStruct((n_pad, nc_pad), jnp.float32),
        grid_spec=pltpu.PrefetchScalarGridSpec(
            num_scalar_prefetch=0,
            grid=grid,
            in_specs=[
                pl.BlockSpec((tile_n, 1), lambda i, j: (i, 0)),        # inverse
                pl.BlockSpec((tile_n, cp), lambda i, j: (i, 0)),       # parent feats
                pl.BlockSpec((tile_m, nc_pad), lambda i, j: (j, 0)),   # child_proj (M-tiled)
                pl.BlockSpec((cp, nc_pad), lambda i, j: (0, 0)),       # Wp
            ],
            out_specs=pl.BlockSpec((tile_n, nc_pad), lambda i, j: (i, 0)),
            scratch_shapes=[pltpu.VMEM((tile_n, nc_pad), jnp.float32)],
        ),
        compiler_params=pltpu.CompilerParams(
            dimension_semantics=("parallel", "arbitrary"),
            vmem_limit_bytes=48 << 20,   # budgeted for v7x's 64 MiB physical VMEM
        ),
    )(inv_p, par_p, cpj_p, wp_p)
    return out[:n, :num_classes]


# ----------------------------------------------------------------------------
# Synthetic backbone + criteria (plain-JAX glue).
# TODO(synk): the real backbone/criteria are config-built modules (build_model /
# build_criteria); deterministic stand-ins here, not part of the Pallas hot path.
# ----------------------------------------------------------------------------
def synthetic_backbone(feat_in, inverse, w_parent, w_child, num_pooled):
    """Point-wise linear -> parent features; mean-pool by `inverse` -> child features."""
    parent_feat = feat_in @ w_parent                               # (N, Cp)
    pooled_pre = feat_in @ w_child                                 # (N, Cc)
    sums = jax.ops.segment_sum(pooled_pre, inverse, num_segments=num_pooled)
    cnts = jax.ops.segment_sum(jnp.ones((feat_in.shape[0], 1), jnp.float32),
                               inverse, num_segments=num_pooled)
    child_feat = sums / jnp.maximum(cnts, 1.0)                     # (M, Cc)
    return parent_feat, child_feat


def cross_entropy(logits, labels):
    logz = jax.nn.logsumexp(logits, axis=-1)
    picked = jnp.take_along_axis(logits, labels[:, None], axis=-1)[:, 0]
    return jnp.mean(logz - picked)


def default_segmentor_v2_forward(input_dict, params, **tile_kwargs):
    """Eval-mode forward of DefaultSegmentorV2 (with optional 'segment')."""
    parent_feat, child_feat = synthetic_backbone(
        input_dict["feat"], input_dict["pooling_inverse"],
        params["w_backbone_parent"], params["w_backbone_child"],
        params["num_pooled"])
    seg_logits = unpool_and_seg_head(
        input_dict["pooling_inverse"], parent_feat, child_feat,
        params["seg_head_w"], params["seg_head_b"], **tile_kwargs)
    return_dict = {}
    if "segment" in input_dict:
        return_dict["loss"] = cross_entropy(seg_logits, input_dict["segment"])
    return_dict["seg_logits"] = seg_logits
    return return_dict


if __name__ == "__main__":
    # small shapes consistent with the module (N NOT a tile multiple on purpose)
    N = 200            # number of points
    M = 40             # number of pooled (child) points
    IN_CH = 6          # raw point feature channels
    CP = 16            # parent feature channels from backbone
    CC = 16            # child feature channels from backbone
    BACKBONE_OUT = CP + CC      # backbone_out_channels = 32
    NUM_CLASSES = 13

    key = jax.random.PRNGKey(0)
    k1, k2, k3, k4, k5, k6, k7 = jax.random.split(key, 7)

    params = {
        "w_backbone_parent": jax.random.normal(k1, (IN_CH, CP), jnp.float32) * 0.1,
        "w_backbone_child": jax.random.normal(k2, (IN_CH, CC), jnp.float32) * 0.1,
        "seg_head_w": jax.random.normal(k3, (NUM_CLASSES, BACKBONE_OUT), jnp.float32) * 0.1,
        "seg_head_b": jax.random.normal(k4, (NUM_CLASSES,), jnp.float32) * 0.01,
        "num_pooled": M,
    }

    input_dict = {
        "feat": jax.random.normal(k5, (N, IN_CH), jnp.float32),
        "pooling_inverse": jax.random.randint(k6, (N,), 0, M, jnp.int32),
        "segment": jax.random.randint(k7, (N,), 0, NUM_CLASSES, jnp.int32),
    }

    # pure-JAX reference for the Pallas hot path (unpool + seg head)
    parent_feat, child_feat = synthetic_backbone(
        input_dict["feat"], input_dict["pooling_inverse"],
        params["w_backbone_parent"], params["w_backbone_child"], M)
    ref_feat = jnp.concatenate(
        [parent_feat, child_feat[input_dict["pooling_inverse"]]], axis=-1)
    ref_logits = ref_feat @ params["seg_head_w"].T + params["seg_head_b"]

    # 1) default (large) tiles -- clamped for the small toy shapes
    out = default_segmentor_v2_forward(input_dict, params)
    seg_logits = jax.block_until_ready(out["seg_logits"])
    loss = jax.block_until_ready(out["loss"])
    assert seg_logits.shape == (N, NUM_CLASSES)
    assert jnp.allclose(seg_logits, ref_logits, atol=2e-2, rtol=2e-2)  # bf16 MXU inputs
    assert jnp.isfinite(loss)

    # 2) small explicit tiles -> exercises multi-tile grid, row padding and the
    #    M-tiled accumulator (pl.when init/finalize) path
    out2 = default_segmentor_v2_forward(input_dict, params, tile_n=64, tile_m=16)
    seg_logits2 = jax.block_until_ready(out2["seg_logits"])
    assert seg_logits2.shape == (N, NUM_CLASSES)
    assert jnp.allclose(seg_logits2, ref_logits, atol=2e-2, rtol=2e-2)

    print("KERNEL_OK")
</pallas_src>

<mosaic_0001>
module attributes {stable_mosaic.version = 11 : i64} {
  func.func @_unpool_seghead_kernel(%arg0: i32, %arg1: i32, %arg2: memref<200x1xi32, #tpu.memory_space<vmem>>, %arg3: memref<200x16xbf16, #tpu.memory_space<vmem>>, %arg4: memref<40x128xbf16, #tpu.memory_space<vmem>>, %arg5: memref<16x128xbf16, #tpu.memory_space<vmem>>, %arg6: memref<200x128xf32, #tpu.memory_space<vmem>>, %arg7: memref<200x128xf32, #tpu.memory_space<vmem>>) attributes {dimension_semantics = [#tpu.dimension_semantics<parallel>, #tpu.dimension_semantics<arbitrary>], iteration_bounds = array<i64: 1, 1>, scalar_prefetch = 0 : i64, scratch_operands = 1 : i64, tpu.core_type = #tpu.core_type<tc>, window_params = [{transform_indices = @transform_0, window_bounds = array<i64: 200, 1>}, {transform_indices = @transform_1, window_bounds = array<i64: 200, 16>}, {transform_indices = @transform_2, window_bounds = array<i64: 40, 128>}, {pipeline_mode = #tpu.pipeline_mode<synchronous>, transform_indices = @transform_3, window_bounds = array<i64: 16, 128>}, {transform_indices = @transform_4, window_bounds = array<i64: 200, 128>}]} {
    %c0_i32 = arith.constant 0 : i32
    %0 = arith.cmpi eq, %arg1, %c0_i32 : i32
    %1 = arith.extui %0 : i1 to i32
    %c0_i32_0 = arith.constant 0 : i32
    %2 = arith.cmpi ne, %1, %c0_i32_0 : i32
    scf.if %2 {
      %c0_10 = arith.constant 0 : index
      %c0_11 = arith.constant 0 : index
      %21 = vector.load %arg3[%c0_10, %c0_11] : memref<200x16xbf16, #tpu.memory_space<vmem>>, vector<200x16xbf16>
      %c0_12 = arith.constant 0 : index
      %c0_13 = arith.constant 0 : index
      %22 = vector.load %arg5[%c0_12, %c0_13] : memref<16x128xbf16, #tpu.memory_space<vmem>>, vector<16x128xbf16>
      %cst_14 = arith.constant dense<0.000000e+00> : vector<200x128xf32>
      %23 = tpu.matmul %21, %22, %cst_14 {dimension_numbers = #tpu.dot_dimension_numbers<[1], [0], [0], [1], [0, 0, 1, 1], [], []>} : vector<200x16xbf16>, vector<16x128xbf16>, vector<200x128xf32> -> vector<200x128xf32>
      %c0_15 = arith.constant 0 : index
      %c0_16 = arith.constant 0 : index
      %24 = vector.load %arg7[%c0_15, %c0_16] : memref<200x128xf32, #tpu.memory_space<vmem>>, vector<200x128xf32>
      tpu.vector_store %arg7[%c0_15, %c0_16], %23 {strides = array<i32>} : memref<200x128xf32, #tpu.memory_space<vmem>>, vector<200x128xf32>,
    } else {
    }
    %c0 = arith.constant 0 : index
    %c0_1 = arith.constant 0 : index
    %3 = vector.load %arg2[%c0, %c0_1] : memref<200x1xi32, #tpu.memory_space<vmem>>, vector<200x1xi32>
    %4 = tpu.iota {dimensions = array<i32: 1>} : vector<200x40xi32>
    %c40_i32 = arith.constant 40 : i32
    %5 = arith.muli %arg1, %c40_i32 : i32
    %6 = vector.broadcast %5 : i32 to vector<200x40xi32>
    %7 = arith.addi %4, %6 : vector<200x40xi32>
    %8 = vector.broadcast %3 : vector<200x1xi32> to vector<200x40xi32>
    %9 = arith.cmpi eq, %7, %8 : vector<200x40xi32>
    %10 = arith.extui %9 : vector<200x40xi1> to vector<200x40xi32>
    %11 = arith.sitofp %10 : vector<200x40xi32> to vector<200x40xf32>
    %12 = arith.truncf %11 : vector<200x40xf32> to vector<200x40xbf16>
    %c0_2 = arith.constant 0 : index
    %c0_3 = arith.constant 0 : index
    %13 = vector.load %arg7[%c0_2, %c0_3] : memref<200x128xf32, #tpu.memory_space<vmem>>, vector<200x128xf32>
    %c0_4 = arith.constant 0 : index
    %c0_5 = arith.constant 0 : index
    %14 = vector.load %arg4[%c0_4, %c0_5] : memref<40x128xbf16, #tpu.memory_space<vmem>>, vector<40x128xbf16>
    %cst = arith.constant dense<0.000000e+00> : vector<200x128xf32>
    %15 = tpu.matmul %12, %14, %cst {dimension_numbers = #tpu.dot_dimension_numbers<[1], [0], [0], [1], [0, 0, 1, 1], [], []>} : vector<200x40xbf16>, vector<40x128xbf16>, vector<200x128xf32> -> vector<200x128xf32>
    %16 = arith.addf %13, %15 : vector<200x128xf32>
    %c0_6 = arith.constant 0 : index
    %c0_7 = arith.constant 0 : index
    %17 = vector.load %arg7[%c0_6, %c0_7] : memref<200x128xf32, #tpu.memory_space<vmem>>, vector<200x128xf32>
    tpu.vector_store %arg7[%c0_6, %c0_7], %16 {strides = array<i32>} : memref<200x128xf32, #tpu.memory_space<vmem>>, vector<200x128xf32>,
    %c0_i32_8 = arith.constant 0 : i32
    %18 = arith.cmpi eq, %arg1, %c0_i32_8 : i32
    %19 = arith.extui %18 : i1 to i32
    %c0_i32_9 = arith.constant 0 : i32
    %20 = arith.cmpi ne, %19, %c0_i32_9 : i32
    scf.if %20 {
      %c0_10 = arith.constant 0 : index
      %c0_11 = arith.constant 0 : index
      %21 = vector.load %arg7[%c0_10, %c0_11] : memref<200x128xf32, #tpu.memory_space<vmem>>, vector<200x128xf32>
      %c0_12 = arith.constant 0 : index
      %c0_13 = arith.constant 0 : index
      %22 = vector.load %arg6[%c0_12, %c0_13] : memref<200x128xf32, #tpu.memory_space<vmem>>, vector<200x128xf32>
      tpu.vector_store %arg6[%c0_12, %c0_13], %21 {strides = array<i32>} : memref<200x128xf32, #tpu.memory_space<vmem>>, vector<200x128xf32>,
    } else {
    }
    return
  }
  func.func @transform_0(%arg0: i32, %arg1: i32) -> (i32, i32) {
    %c0_i32 = arith.constant 0 : i32
    %c0_i32_0 = arith.constant 0 : i32
    return %arg0, %c0_i32 : i32, i32
  }
  func.func @transform_1(%arg0: i32, %arg1: i32) -> (i32, i32) {
    %c0_i32 = arith.constant 0 : i32
    %c0_i32_0 = arith.constant 0 : i32
    return %arg0, %c0_i32 : i32, i32
  }
  func.func @transform_2(%arg0: i32, %arg1: i32) -> (i32, i32) {
    %c0_i32 = arith.constant 0 : i32
    %c0_i32_0 = arith.constant 0 : i32
    return %arg1, %c0_i32 : i32, i32
  }
  func.func @transform_3(%arg0: i32, %arg1: i32) -> (i32, i32) {
    %c0_i32 = arith.constant 0 : i32
    %c0_i32_0 = arith.constant 0 : i32
    %c0_i32_1 = arith.constant 0 : i32
    return %c0_i32, %c0_i32_0 : i32, i32
  }
  func.func @transform_4(%arg0: i32, %arg1: i32) -> (i32, i32) {
    %c0_i32 = arith.constant 0 : i32
    %c0_i32_0 = arith.constant 0 : i32
    return %arg0, %c0_i32 : i32, i32
  }
}

</mosaic_0001>

<bundles_post_ra>
// kernel: tpu_custom_call.1
= control target key start
LH: loop header
LB: loop body
LE: loop exit
PB: predicated region body
PF: predicated region fallthrough
CT: control target
= control target key end

     0   :  { %v1141_v2 = vmov 0   ;;  %v1142_v5 = vmov 0.0   ;;  %vm1143_vm0 = vmmov 0   ;;  %vm598_vm1 = vcmask 1043456   ;;  %s1504_s0 = inlined_call_operand.vmem [shape: s32[200,1], index: 0, kind: input, shape index: {}]   ;;  %s1505_s1 = inlined_call_operand.vmem [shape: bf16[200,16], index: 1, kind: input, shape index: {}]   ;;  %s1506_s2 = inlined_call_operand.vmem [shape: bf16[40,128], index: 2, kind: input, shape index: {}]   ;;  %s1507_s3 = inlined_call_operand.vmem [shape: bf16[16,128], index: 3, kind: input, shape index: {}]   ;;  %s1508_s4 = inlined_call_operand.hbm [shape: f32[200,128], index: 4, kind: output, shape index: {}]  }
   0x1   :  { %v322_v0 = vld [vmem:[%s1504_s0 + $0x10] sm:$0xff]  ;;  %v320_v1 = vld [vmem:[%s1504_s0] sm:$0xff]  ;;  %1099 = vset.pattern.permute.xlu1 %v1141_v2  ;;  %1098 = vset.pattern.permute.xlu0 %v1141_v2  ;;  %v323_v3 = vld [vmem:[%s1504_s0 + $0x18] sm:$0xff]  ;;  %vm119_vm2 = vcmask 130048  }
   0x2   :  { %357 = vperm.xlu1 %1099, %v322_v0   ;;  %351 = vperm.xlu0 %1098, %v320_v1   ;;  %v321_v4 = vld [vmem:[%s1504_s0 + $0x8] sm:$0xff]  ;;  %v324_v7 = vld [vmem:[%s1504_s0 + $0x20] sm:$0xff]  ;;  %v327_v8 = vld [vmem:[%s1504_s0 + $0x38] sm:$0xff] }
   0x3   :  { %1009 = vmatprep.subr.bf16.mxu0 %v1142_v5  ;;  %955 = vmatprep.subr.bf16.mxu1 %v1142_v5  ;;  %v325_v6 = vld [vmem:[%s1504_s0 + $0x28] sm:$0xff]  ;;  %v326_v9 = vld [vmem:[%s1504_s0 + $0x30] sm:$0xff]  ;;  %v1100_v10 = vld [vmem:[%s1506_s2] sm:$0xff]  }
   0x4   :  { %957 = vmatprep.mubr.msk.bf16.mxu1 %vm1143_vm0, %v1142_v5  ;;  %1015 = vmatprep.mubr.msk.bf16.mxu0 %vm1143_vm0, %v1142_v5  ;;  %v1101_v11 = vld [vmem:[%s1506_s2 + $0x8] sm:$0xff]   ;;  %v1102_v12 = vld [vmem:[%s1507_s3] sm:$0xff]   ;;  %v1104_v14 = vld [vmem:[%s1506_s2 + $0x10] ss:$0 sps:$4 sm:$0xff]  }
   0x5   :  { %1010 = vmatpush3.bf16.msra.mxu0 %v1100_v10  ;;  %v1103_v13 = vld [vmem:[%s1505_s1] sm:$0xff]   ;;  %v329_v15 = vld [vmem:[%s1504_s0 + $0x48] sm:$0xff]  ;;  %956 = vmatpush3.bf16.msra.mxu1 %v1102_v12  ;;  %v600_v17 = vsel %vm598_vm1, %v1104_v14, 0  ;;  %v331_v18 = vld [vmem:[%s1504_s0 + $0x58] sm:$0xff] }
   0x6   :  { %360 = vperm.xlu1 %1099, %v323_v3   ;;  %354 = vperm.xlu0 %1098, %v321_v4   ;;  %v328_v16 = vld [vmem:[%s1504_s0 + $0x40] sm:$0xff]  ;;  %v330_v19 = vld [vmem:[%s1504_s0 + $0x50] sm:$0xff]  ;;  %v1105_v20 = vld [vmem:[%s1505_s1 + $0x8] sm:$0xff]  }
   0x7   :  { %1011 = vmatprep.subr.bf16.mxu0 %v1142_v5 }
   0x8   :  { %958 = vmatmul.mubr.msk.bf16.vlgmr.msra.gmra.mrb[0].mxu1 %vm119_vm2, %v1103_v13 }
   0x9   :  { %1012 = vmatpush3.bf16.msra.mxu0 %v1101_v11  ;;  %961 = vmatprep.mubr.msk.bf16.mxu1 %vm1143_vm0, %v1142_v5 }
   0xa   :  { %366 = vperm.xlu1 %1099, %v325_v6   ;;  %363 = vperm.xlu0 %1098, %v324_v7  }
   0xb   :  { %1013 = vmatprep.subr.bf16.mxu0 %v1142_v5 }
   0xd   :  { %1014 = vmatpush3.bf16.msra.mxu0 %v600_v17 }
   0xe   :  { %372 = vperm.xlu1 %1099, %v327_v8   ;;  %369 = vperm.xlu0 %1098, %v326_v9  }
  0x12   :  { %378 = vperm.xlu1 %1099, %v329_v15   ;;  %375 = vperm.xlu0 %1098, %v328_v16  }
  0x13   :  { %9 = vsyncpa [#allocation4], 0  ;;  %v333_v21 = vld [vmem:[%s1504_s0 + $0x68] sm:$0xff]  ;;  %v332_v22 = vld [vmem:[%s1504_s0 + $0x60] sm:$0xff]  ;;  %962 = vmatmul.mubr.msk.bf16.gmra.mrb[4].mxu1 %vm119_vm2, %v1105_v20  ;;  %v345_v45 = vlaneseq  ;;  %vm558_vm5 = vcmask 326656  }
  0x14   :  { %965 = vmatprep.mubr.msk.bf16.mxu1 %vm1143_vm0, %v1142_v5  ;;  %v335_v23 = vld [vmem:[%s1504_s0 + $0x78] sm:$0xff]  ;;  %v334_v24 = vld [vmem:[%s1504_s0 + $0x70] sm:$0xff]  ;;  %v337_v26 = vld [vmem:[%s1504_s0 + $0x88] sm:$0xff] }
  0x15   :  { %v1106_v25 = vld [vmem:[%s1505_s1 + $0x10] sm:$0xff]   ;;  %v336_v27 = vld [vmem:[%s1504_s0 + $0x80] sm:$0xff]  ;;  %v339_v28 = vld [vmem:[%s1504_s0 + $0x98] sm:$0xff]  ;;  %v1343_v46 = vand.u32 127, %v345_v45 }
  0x16   :  { %384 = vperm.xlu1 %1099, %v331_v18   ;;  %381 = vperm.xlu0 %1098, %v330_v19   ;;  %v338_v29 = vld [vmem:[%s1504_s0 + $0x90] sm:$0xff]  ;;  %v1107_v30 = vld [vmem:[%s1505_s1 + $0x18] sm:$0xff]   ;;  %v341_v31 = vld [vmem:[%s1504_s0 + $0xa8] sm:$0xff] }
  0x17   :  { %v340_v32 = vld [vmem:[%s1504_s0 + $0xa0] sm:$0xff]  ;;  %v343_v33 = vld [vmem:[%s1504_s0 + $0xb8] sm:$0xff]  ;;  %v342_v34 = vld [vmem:[%s1504_s0 + $0xb0] sm:$0xff] }
  0x18   :  { %v1108_v35 = vld [vmem:[%s1505_s1 + $0x20] sm:$0xff]   ;;  %v1109_v37 = vld [vmem:[%s1505_s1 + $0x28] sm:$0xff]   ;;  %v1110_v38 = vld [vmem:[%s1505_s1 + $0x30] sm:$0xff]  }
  0x19   :  { %v344_v36 = vld [vmem:[%s1504_s0 + $0xc0] sm:$0xff]  ;;  %v1111_v39 = vld [vmem:[%s1505_s1 + $0x38] sm:$0xff]   ;;  %v1113_v41 = vld [vmem:[%s1505_s1 + $0x48] sm:$0xff]  }
  0x1a   :  { %390 = vperm.xlu1 %1099, %v333_v21   ;;  %387 = vperm.xlu0 %1098, %v332_v22   ;;  %v1112_v40 = vld [vmem:[%s1505_s1 + $0x40] sm:$0xff]   ;;  %v1114_v42 = vld [vmem:[%s1505_s1 + $0x50] sm:$0xff]   ;;  %v1115_v43 = vld [vmem:[%s1505_s1 + $0x58] sm:$0xff]  }
  0x1b   :  { %966 = vmatmul.mubr.msk.bf16.gmra.mrb[8].mxu1 %vm119_vm2, %v1106_v25  ;;  %v1116_v44 = vld [vmem:[%s1505_s1 + $0x60] ss:$0 sps:$4 sm:$0xff]   ;;  %s1144_s1 = smov [#allocation3]  }
  0x1c   :  { %969 = vmatprep.mubr.msk.bf16.mxu1 %vm1143_vm0, %v1142_v5  ;;  %s846_s16 = sshll.u32 %s1144_s1, 4  ;;  %s847_s16 = int_to_ptr.vmem [resolvable:$true] %s846_s16 }
  0x1d   :  { %s1117_s3 = scalar_lea.vmem %s847_s16, 3200  ;;  %p1122_p1 = scmp.lt.s32.totalorder %s847_s16, %s847_s16 }
  0x1e   :  { %396 = vperm.xlu1 %1099, %v335_v23   ;;  %393 = vperm.xlu0 %1098, %v334_v24   ;;  %p1118_p0 = scmp.ne.s32.totalorder %s847_s16, %s1117_s3  ;;  %p1123_p2 = scmp.lt.s32.totalorder %s1117_s3, %s1117_s3 }
  0x20   :  { %p1124_p3 = por %p1123_p2, %p1122_p1 }
  0x22   :  { %402 = vperm.xlu1 %1099, %v337_v26   ;;  %399 = vperm.xlu0 %1098, %v336_v27   ;;  %p1125_p4 = pnand %p1124_p3, %p1118_p0 }
  0x23   :  { %970 = vmatmul.mubr.msk.bf16.gmra.mrb[12].mxu1 %vm119_vm2, %v1107_v30 }
  0x24   :  { %973 = vmatprep.mubr.msk.bf16.mxu1 %vm1143_vm0, %v1142_v5 }
  0x26   :  { %408 = vperm.xlu1 %1099, %v339_v28   ;;  %405 = vperm.xlu0 %1098, %v338_v29  }
  0x2a   :  { %414 = vperm.xlu1 %1099, %v341_v31   ;;  %411 = vperm.xlu0 %1098, %v340_v32  }
  0x2b   :  { %974 = vmatmul.mubr.msk.bf16.gmra.mrb[16].mxu1 %vm119_vm2, %v1108_v35 }
  0x2c   :  { %977 = vmatprep.mubr.msk.bf16.mxu1 %vm1143_vm0, %v1142_v5 }
  0x2e   :  { %420 = vperm.xlu1 %1099, %v343_v33   ;;  %417 = vperm.xlu0 %1098, %v342_v34  }
  0x32   :  { %423 = vperm.xlu0 %1098, %v344_v36  }
  0x33   :  { %978 = vmatmul.mubr.msk.bf16.gmra.mrb[20].mxu1 %vm119_vm2, %v1109_v37 }
  0x34   :  { %981 = vmatprep.mubr.msk.bf16.mxu1 %vm1143_vm0, %v1142_v5 }
  0x3b   :  { %982 = vmatmul.mubr.msk.bf16.gmra.mrb[24].mxu1 %vm119_vm2, %v1110_v38 }
  0x3c   :  { %985 = vmatprep.mubr.msk.bf16.mxu1 %vm1143_vm0, %v1142_v5 }
  0x43   :  { %986 = vmatmul.mubr.msk.bf16.gmra.mrb[28].mxu1 %vm119_vm2, %v1111_v39 }
  0x44   :  { %989 = vmatprep.mubr.msk.bf16.mxu1 %vm1143_vm0, %v1142_v5 }
  0x4b   :  { %990 = vmatmul.mubr.msk.bf16.gmra.mrb[32].mxu1 %vm119_vm2, %v1112_v40 }
  0x4c   :  { %993 = vmatprep.mubr.msk.bf16.mxu1 %vm1143_vm0, %v1142_v5 }
  0x53   :  { %994 = vmatmul.mubr.msk.bf16.gmra.mrb[36].mxu1 %vm119_vm2, %v1113_v41 }
  0x54   :  { %997 = vmatprep.mubr.msk.bf16.mxu1 %vm1143_vm0, %v1142_v5 }
  0x5b   :  { %998 = vmatmul.mubr.msk.bf16.gmra.mrb[40].mxu1 %vm119_vm2, %v1114_v42 }
  0x5c   :  { %1001 = vmatprep.mubr.msk.bf16.mxu1 %vm1143_vm0, %v1142_v5 }
  0x63   :  { %1002 = vmatmul.mubr.msk.bf16.gmra.mrb[44].mxu1 %vm119_vm2, %v1115_v43 }
  0x64   :  { %1005 = vmatprep.mubr.msk.bf16.mxu1 %vm1143_vm0, %v1142_v5 }
  0x6b   :  { %1006 = vmatmul.mubr.msk.bf16.gmra.mrb[48].mxu1 %vm119_vm2, %v1116_v44 }
  0x81   :  { %v352_v47 = vpop.permute.xlu0 %351  ;;  %v358_v48 = vpop.permute.xlu1 %357 }
  0x82   :  { %vm425_vm3 = vcmp.eq.s32.totalorder %v1343_v46, %v352_v47  ;;  %vm427_vm6 = vcmp.eq.s32.totalorder %v1343_v46, %v358_v48 }
  0x83   :  { %v884_v50 = vsel %vm425_vm3, 1.0, %v1142_v5  ;;  %v886_v54 = vsel %vm427_vm6, 1.0, %v1142_v5 }
  0x85   :  { %v355_v49 = vpop.permute.xlu0 %354  ;;  %v361_v53 = vpop.permute.xlu1 %360 }
  0x86   :  { %vm426_vm4 = vcmp.eq.s32.totalorder %v1343_v46, %v355_v49  ;;  %vm428_vm7 = vcmp.eq.s32.totalorder %v1343_v46, %v361_v53 }
  0x87   :  { %v885_v51 = vsel %vm426_vm4, 1.0, %v1142_v5  ;;  %v887_v55 = vsel %vm428_vm7, 1.0, %v1142_v5 }
  0x88   :  { %v500_v52 = vpack.c.bf16 %v885_v51, %v884_v50  ;;  %v501_v58 = vpack.c.bf16 %v887_v55, %v886_v54 }
  0x89   :  { %v367_v56 = vpop.permute.xlu1 %366  ;;  %v364_v57 = vpop.permute.xlu0 %363 }
  0x8a   :  { %1016 = vmatmul.mubr.msk.bf16.vlgmr.msra.gmra.mrb[0].mxu0 %vm558_vm5, %v500_v52  ;;  %vm430_vm8 = vcmp.eq.s32.totalorder %v1343_v46, %v367_v56  ;;  %vm429_vm9 = vcmp.eq.s32.totalorder %v1343_v46, %v364_v57 }
  0x8b   :  { %1019 = vmatprep.mubr.msk.bf16.mxu0 %vm1143_vm0, %v1142_v5  ;;  %v889_v59 = vsel %vm430_vm8, 1.0, %v1142_v5  ;;  %v888_v60 = vsel %vm429_vm9, 1.0, %v1142_v5 }
  0x8c   :  { %v502_v63 = vpack.c.bf16 %v889_v59, %v888_v60 }
  0x8d   :  { %v373_v61 = vpop.permute.xlu1 %372  ;;  %v370_v62 = vpop.permute.xlu0 %369 }
  0x8e   :  { %vm432_vm10 = vcmp.eq.s32.totalorder %v1343_v46, %v373_v61  ;;  %vm431_vm11 = vcmp.eq.s32.totalorder %v1343_v46, %v370_v62 }
  0x8f   :  { %v891_v0 = vsel %vm432_vm10, 1.0, %v1142_v5  ;;  %v890_v1 = vsel %vm431_vm11, 1.0, %v1142_v5 }
  0x90   :  { %v503_v4 = vpack.c.bf16 %v891_v0, %v890_v1 }
  0x91   :  { %v379_v2 = vpop.permute.xlu1 %378  ;;  %v376_v3 = vpop.permute.xlu0 %375 }
  0x92   :  { %1020 = vmatmul.mubr.msk.bf16.gmra.mrb[4].mxu0 %vm558_vm5, %v501_v58  ;;  %vm434_vm12 = vcmp.eq.s32.totalorder %v1343_v46, %v379_v2  ;;  %vm433_vm13 = vcmp.eq.s32.totalorder %v1343_v46, %v376_v3 }
  0x93   :  { %1023 = vmatprep.mubr.msk.bf16.mxu0 %vm1143_vm0, %v1142_v5  ;;  %v893_v6 = vsel %vm434_vm12, 1.0, %v1142_v5  ;;  %v892_v7 = vsel %vm433_vm13, 1.0, %v1142_v5 }
  0x94   :  { %v504_v10 = vpack.c.bf16 %v893_v6, %v892_v7 }
  0x95   :  { %v385_v8 = vpop.permute.xlu1 %384  ;;  %v382_v9 = vpop.permute.xlu0 %381 }
  0x96   :  { %vm436_vm14 = vcmp.eq.s32.totalorder %v1343_v46, %v385_v8  ;;  %vm435_vm15 = vcmp.eq.s32.totalorder %v1343_v46, %v382_v9 }
  0x97   :  { %v895_v11 = vsel %vm436_vm14, 1.0, %v1142_v5  ;;  %v894_v12 = vsel %vm435_vm15, 1.0, %v1142_v5 }
  0x98   :  { %v505_v15 = vpack.c.bf16 %v895_v11, %v894_v12 }
  0x99   :  { %v391_v13 = vpop.permute.xlu1 %390  ;;  %v388_v14 = vpop.permute.xlu0 %387 }
  0x9a   :  { %1024 = vmatmul.mubr.msk.bf16.gmra.mrb[8].mxu0 %vm558_vm5, %v502_v63  ;;  %vm438_vm1 = vcmp.eq.s32.totalorder %v1343_v46, %v391_v13  ;;  %vm437_vm2 = vcmp.eq.s32.totalorder %v1343_v46, %v388_v14 }
  0x9b   :  { %1027 = vmatprep.mubr.msk.bf16.mxu0 %vm1143_vm0, %v1142_v5  ;;  %v897_v16 = vsel %vm438_vm1, 1.0, %v1142_v5  ;;  %v896_v17 = vsel %vm437_vm2, 1.0, %v1142_v5 }
  0x9c   :  { %v506_v20 = vpack.c.bf16 %v897_v16, %v896_v17 }
  0x9d   :  { %v397_v18 = vpop.permute.xlu1 %396  ;;  %v394_v19 = vpop.permute.xlu0 %393 }
  0x9e   :  { %vm440_vm3 = vcmp.eq.s32.totalorder %v1343_v46, %v397_v18  ;;  %vm439_vm4 = vcmp.eq.s32.totalorder %v1343_v46, %v394_v19 }
  0x9f   :  { %v899_v21 = vsel %vm440_vm3, 1.0, %v1142_v5  ;;  %v898_v22 = vsel %vm439_vm4, 1.0, %v1142_v5 }
  0xa0   :  { %v507_v25 = vpack.c.bf16 %v899_v21, %v898_v22 }
  0xa1   :  { %v403_v23 = vpop.permute.xlu1 %402  ;;  %v400_v24 = vpop.permute.xlu0 %399 }
  0xa2   :  { %1028 = vmatmul.mubr.msk.bf16.gmra.mrb[12].mxu0 %vm558_vm5, %v503_v4  ;;  %vm442_vm6 = vcmp.eq.s32.totalorder %v1343_v46, %v403_v23  ;;  %vm441_vm7 = vcmp.eq.s32.totalorder %v1343_v46, %v400_v24 }
  0xa3   :  { %1031 = vmatprep.mubr.msk.bf16.mxu0 %vm1143_vm0, %v1142_v5  ;;  %v901_v26 = vsel %vm442_vm6, 1.0, %v1142_v5  ;;  %v900_v27 = vsel %vm441_vm7, 1.0, %v1142_v5 }
  0xa4   :  { %v508_v30 = vpack.c.bf16 %v901_v26, %v900_v27 }
  0xa5   :  { %v409_v28 = vpop.permute.xlu1 %408  ;;  %v406_v29 = vpop.permute.xlu0 %405 }
  0xa6   :  { %vm444_vm8 = vcmp.eq.s32.totalorder %v1343_v46, %v409_v28  ;;  %vm443_vm9 = vcmp.eq.s32.totalorder %v1343_v46, %v406_v29 }
  0xa7   :  { %v903_v31 = vsel %vm444_vm8, 1.0, %v1142_v5  ;;  %v902_v32 = vsel %vm443_vm9, 1.0, %v1142_v5 }
  0xa8   :  { %v509_v35 = vpack.c.bf16 %v903_v31, %v902_v32 }
  0xa9   :  { %v415_v33 = vpop.permute.xlu1 %414  ;;  %v412_v34 = vpop.permute.xlu0 %411 }
  0xaa   :  { %1032 = vmatmul.mubr.msk.bf16.gmra.mrb[16].mxu0 %vm558_vm5, %v504_v10  ;;  %vm446_vm10 = vcmp.eq.s32.totalorder %v1343_v46, %v415_v33  ;;  %vm445_vm11 = vcmp.eq.s32.totalorder %v1343_v46, %v412_v34 }
  0xab   :  { %1035 = vmatprep.mubr.msk.bf16.mxu0 %vm1143_vm0, %v1142_v5  ;;  %v905_v36 = vsel %vm446_vm10, 1.0, %v1142_v5  ;;  %v904_v37 = vsel %vm445_vm11, 1.0, %v1142_v5 }
  0xac   :  { %v510_v40 = vpack.c.bf16 %v905_v36, %v904_v37 }
  0xad   :  { %v421_v38 = vpop.permute.xlu1 %420  ;;  %v418_v39 = vpop.permute.xlu0 %417 }
  0xae   :  { %vm448_vm12 = vcmp.eq.s32.totalorder %v1343_v46, %v421_v38  ;;  %vm447_vm13 = vcmp.eq.s32.totalorder %v1343_v46, %v418_v39 }
  0xaf   :  { %v907_v41 = vsel %vm448_vm12, 1.0, %v1142_v5  ;;  %v906_v42 = vsel %vm447_vm13, 1.0, %v1142_v5 }
  0xb0   :  { %v511_v44 = vpack.c.bf16 %v907_v41, %v906_v42 }
  0xb1   :  { %v424_v43 = vpop.permute.xlu0 %423 }
  0xb2   :  { %1036 = vmatmul.mubr.msk.bf16.gmra.mrb[20].mxu0 %vm558_vm5, %v505_v15  ;;  %vm449_vm14 = vcmp.eq.s32.totalorder %v1343_v46, %v424_v43 }
  0xb3   :  { %1039 = vmatprep.mubr.msk.bf16.mxu0 %vm1143_vm0, %v1142_v5  ;;  %v908_v48 = vsel %vm449_vm14, 1.0, %v1142_v5 }
  0xb4   :  { %v512_v51 = vpack.c.bf16 %v908_v48, %v908_v48 }
  0xba   :  { %1040 = vmatmul.mubr.msk.bf16.gmra.mrb[24].mxu0 %vm558_vm5, %v506_v20 }
  0xbb   :  { %1043 = vmatprep.mubr.msk.bf16.mxu0 %vm1143_vm0, %v1142_v5 }
  0xc2   :  { %1044 = vmatmul.mubr.msk.bf16.gmra.mrb[28].mxu0 %vm558_vm5, %v507_v25 }
  0xc3   :  { %1047 = vmatprep.mubr.msk.bf16.mxu0 %vm1143_vm0, %v1142_v5 }
  0xca   :  { %1048 = vmatmul.mubr.msk.bf16.gmra.mrb[32].mxu0 %vm558_vm5, %v508_v30 }
  0xcb   :  { %1051 = vmatprep.mubr.msk.bf16.mxu0 %vm1143_vm0, %v1142_v5 }
  0xd2   :  { %1052 = vmatmul.mubr.msk.bf16.gmra.mrb[36].mxu0 %vm558_vm5, %v509_v35 }
  0xd3   :  { %1055 = vmatprep.mubr.msk.bf16.mxu0 %vm1143_vm0, %v1142_v5 }
  0xda   :  { %1056 = vmatmul.mubr.msk.bf16.gmra.mrb[40].mxu0 %vm558_vm5, %v510_v40 }
  0xdb   :  { %1059 = vmatprep.mubr.msk.bf16.mxu0 %vm1143_vm0, %v1142_v5  ;;  %v193_v45 = vpop.f32.mrb[0].mxu1 }
  0xdc   :  { %v959_v47 = vpop.f32.mrb[1].mxu1 }
  0xdd   :  { %v196_v49 = vpop.f32.mrb[2].mxu1 }
  0xde   :  { %v960_v50 = vpop.f32.mrb[3].mxu1 }
  0xe2   :  { %1060 = vmatmul.mubr.msk.bf16.gmra.mrb[44].mxu0 %vm558_vm5, %v511_v44 }
  0xe3   :  { %1063 = vmatprep.mubr.msk.bf16.mxu0 %vm1143_vm0, %v1142_v5 }
  0xe6   :  { %v201_v52 = vpop.f32.mrb[4].mxu1 }
  0xe7   :  { %v963_v53 = vpop.f32.mrb[5].mxu1 }
  0xe8   :  { %v204_v54 = vpop.f32.mrb[6].mxu1 }
  0xe9   :  { %v964_v55 = vpop.f32.mrb[7].mxu1 }
  0xea   :  { %1064 = vmatmul.mubr.msk.bf16.gmra.mrb[48].mxu0 %vm558_vm5, %v512_v51 }
  0xee   :  { %v209_v56 = vpop.f32.mrb[8].mxu1 }
  0xef   :  { %v967_v46 = vpop.f32.mrb[9].mxu1 }
  0xf0   :  { %v1432_v57 = vpop.f32.mrb[10].mxu1 }
  0xf1   :  { %v968_v58 = vpop.f32.mrb[11].mxu1 }
  0xf6   :  { %v1434_v59 = vpop.f32.mrb[12].mxu1 }
  0xf7   :  { %v971_v60 = vpop.f32.mrb[13].mxu1 }
  0xf8   :  { %v1436_v61 = vpop.f32.mrb[14].mxu1 }
  0xf9   :  { %v972_v5 = vpop.f32.mrb[15].mxu1 }
  0xfe   :  { %v1438_v62 = vpop.f32.mrb[16].mxu1 }
  0xff   :  { %v975_v63 = vpop.f32.mrb[17].mxu1 }
 0x100   :  { %v1440_v0 = vpop.f32.mrb[18].mxu1 }
 0x101   :  { %v976_v1 = vpop.f32.mrb[19].mxu1 }
 0x106   :  { %v1442_v2 = vpop.f32.mrb[20].mxu1 }
 0x107   :  { %v979_v3 = vpop.f32.mrb[21].mxu1 }
 0x108   :  { %v1444_v4 = vpop.f32.mrb[22].mxu1 }
 0x109   :  { %v980_v6 = vpop.f32.mrb[23].mxu1 }
 0x10e   :  { %v1446_v7 = vpop.f32.mrb[24].mxu1 }
 0x10f   :  { %v983_v8 = vpop.f32.mrb[25].mxu1 }
 0x110   :  { %v1448_v9 = vpop.f32.mrb[26].mxu1 }
 0x111   :  { %v984_v10 = vpop.f32.mrb[27].mxu1 }
 0x116   :  { %v1450_v11 = vpop.f32.mrb[28].mxu1 }
 0x117   :  { %v987_v12 = vpop.f32.mrb[29].mxu1 }
 0x118   :  { %v1452_v13 = vpop.f32.mrb[30].mxu1 }
 0x119   :  { %v988_v14 = vpop.f32.mrb[31].mxu1 }
 0x11e   :  { %v1454_v15 = vpop.f32.mrb[32].mxu1 }
 0x11f   :  { %v991_v16 = vpop.f32.mrb[33].mxu1 }
 0x120   :  { %v1456_v17 = vpop.f32.mrb[34].mxu1 }
 0x121   :  { %v992_v18 = vpop.f32.mrb[35].mxu1 }
 0x126   :  { %v1458_v19 = vpop.f32.mrb[36].mxu1 }
 0x127   :  { %v995_v20 = vpop.f32.mrb[37].mxu1 }
 0x128   :  { %v1460_v21 = vpop.f32.mrb[38].mxu1 }
 0x129   :  { %v996_v22 = vpop.f32.mrb[39].mxu1 }
 0x12e   :  { %v1462_v23 = vpop.f32.mrb[40].mxu1 }
 0x12f   :  { %v999_v24 = vpop.f32.mrb[41].mxu1 }
 0x130   :  { %v1464_v25 = vpop.f32.mrb[42].mxu1 }
 0x131   :  { %v1000_v26 = vpop.f32.mrb[43].mxu1 }
 0x136   :  { %v1466_v27 = vpop.f32.mrb[44].mxu1 }
 0x137   :  { %v1003_v28 = vpop.f32.mrb[45].mxu1 }
 0x138   :  { %v1468_v29 = vpop.f32.mrb[46].mxu1 }
 0x139   :  { %v1004_v30 = vpop.f32.mrb[47].mxu1 }
 0x13e   :  { %v1470_v31 = vpop.f32.mrb[48].mxu1 }
 0x13f   :  { %v1007_v32 = vpop.f32.mrb[49].mxu1 }
 0x140   :  { %v292_v33 = vpop.f32.mrb[50].mxu1 }
 0x141   :  { %v1008_v34 = vpop.f32.mrb[51].mxu1 }
 0x15d   :  { %v636_v35 = vpop.f32.mrb[0].mxu0 }
 0x15e   :  { %v738_v36 = vadd.f32 %v636_v35, %v193_v45  ;;  %v1017_v37 = vpop.f32.mrb[1].mxu0 }
 0x15f   :  { %v639_v38 = vpop.f32.mrb[2].mxu0 }
 0x160   :  { %816 = vst [vmem:[#allocation3] sm:$0xff] %v738_v36  ;;  %v739_v39 = vadd.f32 %v639_v38, %v196_v49  ;;  %v1018_v40 = vpop.f32.mrb[3].mxu0 }
 0x162   :  { %817 = vst [vmem:[#allocation3 + $0x8] sm:$0xff] %v739_v39 }
 0x165   :  { %v644_v41 = vpop.f32.mrb[4].mxu0 }
 0x166   :  { %v740_v42 = vadd.f32 %v644_v41, %v201_v52  ;;  %v1021_v43 = vpop.f32.mrb[5].mxu0 }
 0x167   :  { %v647_v44 = vpop.f32.mrb[6].mxu0 }
 0x168   :  { %818 = vst [vmem:[#allocation3 + $0x10] sm:$0xff] %v740_v42  ;;  %v741_v47 = vadd.f32 %v647_v44, %v204_v54  ;;  %v1022_v48 = vpop.f32.mrb[7].mxu0 }
 0x16a   :  { %819 = vst [vmem:[#allocation3 + $0x18] sm:$0xff] %v741_v47 }
 0x16d   :  { %v652_v50 = vpop.f32.mrb[8].mxu0 }
 0x16e   :  { %v742_v51 = vadd.f32 %v652_v50, %v209_v56  ;;  %v1025_v53 = vpop.f32.mrb[9].mxu0 }
 0x16f   :  { %v655_v55 = vpop.f32.mrb[10].mxu0 }
 0x170   :  { %820 = vst [vmem:[#allocation3 + $0x20] sm:$0xff] %v742_v51  ;;  %v743_v45 = vadd.f32 %v655_v55, %v1432_v57  ;;  %v1026_v46 = vpop.f32.mrb[11].mxu0 }
 0x172   :  { %821 = vst [vmem:[#allocation3 + $0x28] sm:$0xff] %v743_v45 }
 0x175   :  { %v660_v49 = vpop.f32.mrb[12].mxu0 }
 0x176   :  { %v744_v58 = vadd.f32 %v660_v49, %v1434_v59  ;;  %v1029_v60 = vpop.f32.mrb[13].mxu0 }
 0x177   :  { %v663_v52 = vpop.f32.mrb[14].mxu0 }
 0x178   :  { %822 = vst [vmem:[#allocation3 + $0x30] sm:$0xff] %v744_v58  ;;  %v745_v5 = vadd.f32 %v663_v52, %v1436_v61  ;;  %v1030_v54 = vpop.f32.mrb[15].mxu0 }
 0x17a   :  { %823 = vst [vmem:[#allocation3 + $0x38] sm:$0xff] %v745_v5 }
 0x17d   :  { %v668_v63 = vpop.f32.mrb[16].mxu0 }
 0x17e   :  { %v746_v56 = vadd.f32 %v668_v63, %v1438_v62  ;;  %v1033_v1 = vpop.f32.mrb[17].mxu0 }
 0x17f   :  { %v671_v3 = vpop.f32.mrb[18].mxu0 }
 0x180   :  { %824 = vst [vmem:[#allocation3 + $0x40] sm:$0xff] %v746_v56  ;;  %v747_v57 = vadd.f32 %v671_v3, %v1440_v0  ;;  %v1034_v6 = vpop.f32.mrb[19].mxu0 }
 0x182   :  { %825 = vst [vmem:[#allocation3 + $0x48] sm:$0xff] %v747_v57 }
 0x185   :  { %v676_v8 = vpop.f32.mrb[20].mxu0 }
 0x186   :  { %v748_v59 = vadd.f32 %v676_v8, %v1442_v2  ;;  %v1037_v10 = vpop.f32.mrb[21].mxu0 }
 0x187   :  { %v679_v12 = vpop.f32.mrb[22].mxu0 }
 0x188   :  { %826 = vst [vmem:[#allocation3 + $0x50] sm:$0xff] %v748_v59  ;;  %v749_v61 = vadd.f32 %v679_v12, %v1444_v4  ;;  %v1038_v14 = vpop.f32.mrb[23].mxu0 }
 0x18a   :  { %827 = vst [vmem:[#allocation3 + $0x58] sm:$0xff] %v749_v61 }
 0x18d   :  { %v684_v16 = vpop.f32.mrb[24].mxu0 }
 0x18e   :  { %v750_v62 = vadd.f32 %v684_v16, %v1446_v7  ;;  %v1041_v18 = vpop.f32.mrb[25].mxu0 }
 0x18f   :  { %v687_v20 = vpop.f32.mrb[26].mxu0 }
 0x190   :  { %828 = vst [vmem:[#allocation3 + $0x60] sm:$0xff] %v750_v62  ;;  %v751_v0 = vadd.f32 %v687_v20, %v1448_v9  ;;  %v1042_v22 = vpop.f32.mrb[27].mxu0 }
 0x192   :  { %829 = vst [vmem:[#allocation3 + $0x68] sm:$0xff] %v751_v0 }
 0x195   :  { %v692_v24 = vpop.f32.mrb[28].mxu0 }
 0x196   :  { %v752_v2 = vadd.f32 %v692_v24, %v1450_v11  ;;  %v1045_v26 = vpop.f32.mrb[29].mxu0 }
 0x197   :  { %v695_v28 = vpop.f32.mrb[30].mxu0 }
 0x198   :  { %830 = vst [vmem:[#allocation3 + $0x70] sm:$0xff] %v752_v2  ;;  %v753_v4 = vadd.f32 %v695_v28, %v1452_v13  ;;  %v1046_v30 = vpop.f32.mrb[31].mxu0 }
 0x19a   :  { %831 = vst [vmem:[#allocation3 + $0x78] sm:$0xff] %v753_v4 }
 0x19d   :  { %v700_v32 = vpop.f32.mrb[32].mxu0 }
 0x19e   :  { %v754_v7 = vadd.f32 %v700_v32, %v1454_v15  ;;  %v1049_v33 = vpop.f32.mrb[33].mxu0 }
 0x19f   :  { %v703_v34 = vpop.f32.mrb[34].mxu0 }
 0x1a0   :  { %832 = vst [vmem:[#allocation3 + $0x80] sm:$0xff] %v754_v7  ;;  %v755_v9 = vadd.f32 %v703_v34, %v1456_v17  ;;  %v1050_v35 = vpop.f32.mrb[35].mxu0 }
 0x1a2   :  { %833 = vst [vmem:[#allocation3 + $0x88] sm:$0xff] %v755_v9 }
 0x1a5   :  { %v708_v36 = vpop.f32.mrb[36].mxu0 }
 0x1a6   :  { %v756_v11 = vadd.f32 %v708_v36, %v1458_v19  ;;  %v1053_v37 = vpop.f32.mrb[37].mxu0 }
 0x1a7   :  { %v711_v38 = vpop.f32.mrb[38].mxu0 }
 0x1a8   :  { %834 = vst [vmem:[#allocation3 + $0x90] sm:$0xff] %v756_v11  ;;  %v757_v13 = vadd.f32 %v711_v38, %v1460_v21  ;;  %v1054_v39 = vpop.f32.mrb[39].mxu0 }
 0x1aa   :  { %835 = vst [vmem:[#allocation3 + $0x98] sm:$0xff] %v757_v13 }
 0x1ad   :  { %v716_v40 = vpop.f32.mrb[40].mxu0 }
 0x1ae   :  { %v758_v15 = vadd.f32 %v716_v40, %v1462_v23  ;;  %v1057_v41 = vpop.f32.mrb[41].mxu0 }
 0x1af   :  { %v719_v42 = vpop.f32.mrb[42].mxu0 }
 0x1b0   :  { %836 = vst [vmem:[#allocation3 + $0xa0] sm:$0xff] %v758_v15  ;;  %v759_v17 = vadd.f32 %v719_v42, %v1464_v25  ;;  %v1058_v43 = vpop.f32.mrb[43].mxu0 }
 0x1b2   :  { %837 = vst [vmem:[#allocation3 + $0xa8] sm:$0xff] %v759_v17 }
 0x1b5   :  { %v724_v44 = vpop.f32.mrb[44].mxu0 }
 0x1b6   :  { %v760_v19 = vadd.f32 %v724_v44, %v1466_v27  ;;  %v1061_v47 = vpop.f32.mrb[45].mxu0 }
 0x1b7   :  { %v727_v48 = vpop.f32.mrb[46].mxu0 }
 0x1b8   :  { %838 = vst [vmem:[#allocation3 + $0xb0] sm:$0xff] %v760_v19  ;;  %v761_v21 = vadd.f32 %v727_v48, %v1468_v29  ;;  %v1062_v50 = vpop.f32.mrb[47].mxu0 }
 0x1ba   :  { %839 = vst [vmem:[#allocation3 + $0xb8] sm:$0xff] %v761_v21 }
 0x1bd   :  { %v732_v23 = vpop.f32.mrb[48].mxu0 }
 0x1be   :  { %v762_v51 = vadd.f32 %v732_v23, %v1470_v31  ;;  %v1065_v53 = vpop.f32.mrb[49].mxu0 }
 0x1bf   :  { %v735_v25 = vpop.f32.mrb[50].mxu0 }
 0x1c0   :  { %840 = vst [vmem:[#allocation3 + $0xc0] sm:$0xff] %v762_v51  ;;  %v1066_v55 = vpop.f32.mrb[51].mxu0 }
 0x1c1   :  { %1128 = shalt.err (!%p1125_p4)
}
 0x1c2   :  { %s1129_s2 = scalar_lea.hbm %s1508_s4, 3200 }
 0x1c3   :  { %p1130_p5 = scmp.ne.s32.totalorder %s1508_s4, %s1129_s2  ;;  %p1133_p6 = scmp.lt.u32.totalorder %s1129_s2, %s1508_s4 }
 0x1c5   :  { %p1135_p7 = pnand %p1133_p6, %p1130_p5 }
 0x1c7   :  { %1138 = shalt.err (!%p1135_p7)
}
 0x1c8   :  { %s1145_s23 = smov 128   ;;  %s1146_s24 = smov 8  }
 0x1c9   :  { %852 = dma.vmem_to_hbm [thread:$0]  %s847_s16, 3200, %s1508_s4, [#allocation4], %s1145_s23, %s1145_s23, %s1146_s24  }
 0x1ca   :  { %1139 = dma.done.wait [#allocation4], 3200  }
 0x1cb   :  { %1140 = vsyncadd [#allocation4], 4294964096 }
 0x1cc   :  { %856 = vsyncpa [#allocation4], 1 }

</bundles_post_ra>
